<compile_context>
chip_gen: v6e
topology: v6e:2x2x1
jax: 0.10.0
libtpu: 0.0.40
codegen_flags: <defaults>
</compile_context>

<pallas_src>
import math

import jax
import jax.numpy as jnp
from jax import lax
from jax.experimental import pallas as pl
from jax.experimental.pallas import tpu as pltpu


def _round_up(x, m):
    return ((x + m - 1) // m) * m


def _pick_tile(dim, desired, granule):
    """Pad `dim` to a multiple of `granule`; pick the largest tile <= desired
    (multiple of `granule`) that divides the padded extent exactly."""
    padded = _round_up(dim, granule)
    t = min(desired, padded)
    while padded % t:
        t -= granule
    return t, padded


def _conv_gemm_kernel(p_ref, w_ref, b_ref, o_ref):
    # p_ref: (TM, TK) bf16 patches tile, w_ref: (TK, TN) bf16 weight tile,
    # b_ref: (1, TN) f32 bias tile, o_ref: (TM, TN) f32 output tile.
    # The output tile doubles as the accumulator: its block index is constant
    # across the K grid axis, so it stays resident in VMEM and is written back
    # to HBM only when the (i, j) tile changes.
    k = pl.program_id(2)

    @pl.when(k == 0)
    def _():
        o_ref[...] = jnp.zeros_like(o_ref)

    o_ref[...] += jnp.dot(p_ref[...], w_ref[...],
                          preferred_element_type=jnp.float32)

    @pl.when(k == pl.num_programs(2) - 1)
    def _():
        # bias broadcast-added once per output tile, not per K step
        o_ref[...] += b_ref[...]


def _gemm_bias(patches, w2d, b2d, *, tm, tn, tk):
    M, K = patches.shape
    _, N = w2d.shape
    grid = (M // tm, N // tn, K // tk)

    in_bytes = patches.dtype.itemsize
    tile_bytes = (2 * tm * tk * in_bytes      # double-buffered patches tile
                  + 2 * tk * tn * in_bytes    # double-buffered weight tile
                  + 2 * 1 * tn * 4            # bias tile
                  + 2 * tm * tn * 4)          # double-buffered f32 output tile
    # generous headroom, but stay well under v7x's 64 MiB physical VMEM
    vmem_limit = int(min(max(4 * tile_bytes, 32 * 1024 * 1024),
                         48 * 1024 * 1024))

    cost = pl.CostEstimate(
        flops=2 * M * K * N,
        transcendentals=0,
        bytes_accessed=patches.nbytes + w2d.nbytes + b2d.nbytes + M * N * 4,
    )

    return pl.pallas_call(
        _conv_gemm_kernel,
        out_shape=jax.ShapeDtypeStruct((M, N), jnp.float32),
        grid_spec=pltpu.PrefetchScalarGridSpec(
            num_scalar_prefetch=0,
            grid=grid,
            in_specs=[
                pl.BlockSpec((tm, tk), lambda i, j, k: (i, k)),
                pl.BlockSpec((tk, tn), lambda i, j, k: (k, j)),
                pl.BlockSpec((1, tn), lambda i, j, k: (0, j)),
            ],
            out_specs=pl.BlockSpec((tm, tn), lambda i, j, k: (i, j)),
        ),
        compiler_params=pltpu.CompilerParams(
            dimension_semantics=("parallel", "parallel", "arbitrary"),
            vmem_limit_bytes=vmem_limit,
        ),
        cost_estimate=cost,
    )(patches, w2d, b2d)


def custom_conv2d_forward(x, weight, bias, *, stride=1, padding=0, dilation=1,
                          compute_dtype=jnp.bfloat16, tm=256, tn=256, tk=512):
    """x: (B, C, H, W); weight: (OC, C, KH, KW); bias: (OC,) or None.

    Returns (B, OC, OH, OW) float32.  groups=1 only.
    """
    B, C, H, W = x.shape
    OC, Cw, KH, KW = weight.shape
    assert Cw == C, "groups != 1 not supported (matches PyTorch forward semantics)"

    OH = (H + 2 * padding - dilation * (KH - 1) - 1) // stride + 1
    OW = (W + 2 * padding - dilation * (KW - 1) - 1) // stride + 1

    # --- layout: NCHW -> NHWC so channels land on the lane axis ---
    x_nhwc = jnp.transpose(x, (0, 2, 3, 1))
    xp = jnp.pad(x_nhwc, ((0, 0), (padding, padding), (padding, padding), (0, 0)))

    # --- im2col, flat K order = (kh, kw, c), channels innermost (lane-dense) ---
    # TODO(synk): fuse im2col into the kernel (per-tap reduction steps + manual
    # strided DMA over the padded NHWC input) to avoid materializing the
    # KH*KW-times-larger intermediate in HBM for large inputs.
    taps = []
    for kh in range(KH):
        for kw in range(KW):
            h0 = kh * dilation
            w0 = kw * dilation
            taps.append(xp[:, h0:h0 + stride * OH:stride,
                            w0:w0 + stride * OW:stride, :])
    patches = jnp.stack(taps, axis=3)                    # (B, OH, OW, KH*KW, C)
    M = B * OH * OW
    K = KH * KW * C
    patches = patches.reshape(M, K)                      # contiguous, no relayout

    # weight (OC, C, KH, KW) -> (KH, KW, C, OC) -> (K, OC): matches (kh, kw, c)
    w2d = jnp.transpose(weight, (2, 3, 1, 0)).reshape(K, OC)

    # --- tile selection: tiles divide the (8 / 128)-padded extents exactly ---
    tm, M_pad = _pick_tile(M, tm, 8)
    tn, N_pad = _pick_tile(OC, tn, 128)
    tk, K_pad = _pick_tile(K, tk, 128)

    patches = jnp.pad(patches.astype(compute_dtype),
                      ((0, M_pad - M), (0, K_pad - K)))
    w2d = jnp.pad(w2d.astype(compute_dtype),
                  ((0, K_pad - K), (0, N_pad - OC)))
    if bias is None:
        b2d = jnp.zeros((1, N_pad), dtype=jnp.float32)
    else:
        b2d = jnp.pad(bias.astype(jnp.float32).reshape(1, OC),
                      ((0, 0), (0, N_pad - OC)))

    out2d = _gemm_bias(patches, w2d, b2d, tm=tm, tn=tn, tk=tk)

    out = out2d[:M, :OC].reshape(B, OH, OW, OC)
    return jnp.transpose(out, (0, 3, 1, 2))              # NCHW at the API boundary


def init_params(key, in_channels, out_channels, kernel_size, use_bias=True):
    """Deterministic kaiming_uniform(a=sqrt(5))-style init (bound = 1/sqrt(fan_in))."""
    fan_in = in_channels * kernel_size * kernel_size
    bound = 1.0 / math.sqrt(fan_in)
    kw_, kb_ = jax.random.split(key)
    weight = jax.random.uniform(
        kw_, (out_channels, in_channels, kernel_size, kernel_size),
        minval=-bound, maxval=bound, dtype=jnp.float32)
    bias = jax.random.uniform(
        kb_, (out_channels,), minval=-bound, maxval=bound, dtype=jnp.float32
    ) if use_bias else None
    return weight, bias


if __name__ == "__main__":
    key = jax.random.PRNGKey(0)
    kx, kp = jax.random.split(key)

    B, C, H, W = 2, 4, 16, 16
    OC, KS, STRIDE, PAD, DIL = 8, 3, 1, 1, 1

    x = jax.random.normal(kx, (B, C, H, W), dtype=jnp.float32)
    weight, bias = init_params(kp, C, OC, KS, use_bias=True)

    out = custom_conv2d_forward(x, weight, bias,
                                stride=STRIDE, padding=PAD, dilation=DIL)
    out = jax.block_until_ready(out)

    # Reference: XLA conv on the same bf16-rounded operands with f32 accumulation,
    # so the comparison isolates kernel correctness from bf16 input rounding.
    xr = x.astype(jnp.bfloat16).astype(jnp.float32)
    wr = weight.astype(jnp.bfloat16).astype(jnp.float32)
    ref = lax.conv_general_dilated(
        xr, wr, window_strides=(STRIDE, STRIDE),
        padding=[(PAD, PAD), (PAD, PAD)],
        rhs_dilation=(DIL, DIL),
        dimension_numbers=("NCHW", "OIHW", "NCHW"),
        precision=lax.Precision.HIGHEST,
    ) + bias.reshape(1, OC, 1, 1)

    OH = (H + 2 * PAD - DIL * (KS - 1) - 1) // STRIDE + 1
    OW = (W + 2 * PAD - DIL * (KS - 1) - 1) // STRIDE + 1
    assert out.shape == (B, OC, OH, OW), out.shape
    err = float(jnp.max(jnp.abs(out - ref)))
    assert err < 5e-3, err

    print("KERNEL_OK")
</pallas_src>

<mosaic_0001>
module attributes {stable_mosaic.version = 11 : i64} {
  func.func @_conv_gemm_kernel(%arg0: i32, %arg1: i32, %arg2: i32, %arg3: memref<256x128xbf16, #tpu.memory_space<vmem>>, %arg4: memref<128x128xbf16, #tpu.memory_space<vmem>>, %arg5: memref<1x128xf32, #tpu.memory_space<vmem>>, %arg6: memref<256x128xf32, #tpu.memory_space<vmem>>) attributes {dimension_semantics = [#tpu.dimension_semantics<parallel>, #tpu.dimension_semantics<parallel>, #tpu.dimension_semantics<arbitrary>], iteration_bounds = array<i64: 2, 1, 1>, scalar_prefetch = 0 : i64, scratch_operands = 0 : i64, tpu.core_type = #tpu.core_type<tc>, window_params = [{transform_indices = @transform_0, window_bounds = array<i64: 256, 128>}, {transform_indices = @transform_1, window_bounds = array<i64: 128, 128>}, {transform_indices = @transform_2, window_bounds = array<i64: 1, 128>}, {transform_indices = @transform_3, window_bounds = array<i64: 256, 128>}]} {
    %c0_i32 = arith.constant 0 : i32
    %0 = arith.cmpi eq, %arg2, %c0_i32 : i32
    %1 = arith.extui %0 : i1 to i32
    %c0_i32_0 = arith.constant 0 : i32
    %2 = arith.cmpi ne, %1, %c0_i32_0 : i32
    scf.if %2 {
      %cst_10 = arith.constant 0.000000e+00 : f32
      %12 = vector.broadcast %cst_10 : f32 to vector<256x128xf32>
      %c0_11 = arith.constant 0 : index
      %c0_12 = arith.constant 0 : index
      %13 = vector.load %arg6[%c0_11, %c0_12] : memref<256x128xf32, #tpu.memory_space<vmem>>, vector<256x128xf32>
      tpu.vector_store %arg6[%c0_11, %c0_12], %12 {strides = array<i32>} : memref<256x128xf32, #tpu.memory_space<vmem>>, vector<256x128xf32>,
    } else {
    }
    %c0 = arith.constant 0 : index
    %c0_1 = arith.constant 0 : index
    %3 = vector.load %arg6[%c0, %c0_1] : memref<256x128xf32, #tpu.memory_space<vmem>>, vector<256x128xf32>
    %c0_2 = arith.constant 0 : index
    %c0_3 = arith.constant 0 : index
    %4 = vector.load %arg3[%c0_2, %c0_3] : memref<256x128xbf16, #tpu.memory_space<vmem>>, vector<256x128xbf16>
    %c0_4 = arith.constant 0 : index
    %c0_5 = arith.constant 0 : index
    %5 = vector.load %arg4[%c0_4, %c0_5] : memref<128x128xbf16, #tpu.memory_space<vmem>>, vector<128x128xbf16>
    %cst = arith.constant dense<0.000000e+00> : vector<256x128xf32>
    %6 = tpu.matmul %4, %5, %cst {dimension_numbers = #tpu.dot_dimension_numbers<[1], [0], [0], [1], [0, 0, 1, 1], [], []>} : vector<256x128xbf16>, vector<128x128xbf16>, vector<256x128xf32> -> vector<256x128xf32>
    %7 = arith.addf %3, %6 : vector<256x128xf32>
    %c0_6 = arith.constant 0 : index
    %c0_7 = arith.constant 0 : index
    %8 = vector.load %arg6[%c0_6, %c0_7] : memref<256x128xf32, #tpu.memory_space<vmem>>, vector<256x128xf32>
    tpu.vector_store %arg6[%c0_6, %c0_7], %7 {strides = array<i32>} : memref<256x128xf32, #tpu.memory_space<vmem>>, vector<256x128xf32>,
    %c0_i32_8 = arith.constant 0 : i32
    %9 = arith.cmpi eq, %arg2, %c0_i32_8 : i32
    %10 = arith.extui %9 : i1 to i32
    %c0_i32_9 = arith.constant 0 : i32
    %11 = arith.cmpi ne, %10, %c0_i32_9 : i32
    scf.if %11 {
      %c0_10 = arith.constant 0 : index
      %c0_11 = arith.constant 0 : index
      %12 = vector.load %arg6[%c0_10, %c0_11] : memref<256x128xf32, #tpu.memory_space<vmem>>, vector<256x128xf32>
      %c0_12 = arith.constant 0 : index
      %c0_13 = arith.constant 0 : index
      %13 = vector.load %arg5[%c0_12, %c0_13] : memref<1x128xf32, #tpu.memory_space<vmem>>, vector<1x128xf32>
      %14 = vector.broadcast %13 : vector<1x128xf32> to vector<256x128xf32>
      %15 = arith.addf %12, %14 : vector<256x128xf32>
      %c0_14 = arith.constant 0 : index
      %c0_15 = arith.constant 0 : index
      %16 = vector.load %arg6[%c0_14, %c0_15] : memref<256x128xf32, #tpu.memory_space<vmem>>, vector<256x128xf32>
      tpu.vector_store %arg6[%c0_14, %c0_15], %15 {strides = array<i32>} : memref<256x128xf32, #tpu.memory_space<vmem>>, vector<256x128xf32>,
    } else {
    }
    return
  }
  func.func @transform_0(%arg0: i32, %arg1: i32, %arg2: i32) -> (i32, i32) {
    %c0_i32 = arith.constant 0 : i32
    return %arg0, %arg2 : i32, i32
  }
  func.func @transform_1(%arg0: i32, %arg1: i32, %arg2: i32) -> (i32, i32) {
    %c0_i32 = arith.constant 0 : i32
    return %arg2, %arg1 : i32, i32
  }
  func.func @transform_2(%arg0: i32, %arg1: i32, %arg2: i32) -> (i32, i32) {
    %c0_i32 = arith.constant 0 : i32
    %c0_i32_0 = arith.constant 0 : i32
    return %c0_i32, %arg1 : i32, i32
  }
  func.func @transform_3(%arg0: i32, %arg1: i32, %arg2: i32) -> (i32, i32) {
    %c0_i32 = arith.constant 0 : i32
    return %arg0, %arg1 : i32, i32
  }
}

</mosaic_0001>

<bundles_post_ra>
// kernel: tpu_custom_call.1
= control target key start
LH: loop header
LB: loop body
LE: loop exit
PB: predicated region body
PF: predicated region fallthrough
CT: control target
= control target key end

     0   :  { %8 = vsyncpa [#allocation3], 0  ;;  %s1657_s0 = inlined_call_operand.hbm [shape: bf16[512,128], index: 0, kind: input, shape index: {}]   ;;  %s1658_s1 = inlined_call_operand.hbm [shape: bf16[128,128], index: 1, kind: input, shape index: {}]   ;;  %s1659_s2 = inlined_call_operand.vmem [shape: f32[1,128], index: 2, kind: input, shape index: {}]   ;;  %s1660_s3 = inlined_call_operand.hbm [shape: f32[512,128], index: 3, kind: output, shape index: {}]  }
   0x1   :  { %10 = vsyncpa [#allocation3 + $0x1], 0 }
   0x2   :  { %11 = vsyncpa [#allocation6], 0 }
   0x3   :  { %12 = vsyncpa [#allocation4], 0 }
   0x4   :  { %14 = vsyncpa [#allocation4 + $0x1], 0  ;;  %s1379_s12 = smov 0   ;;  %s1381_s13 = smov 0  }
   0x5   :  { %s1383_s14 = smov 0   ;;  %s1385_s15 = smov 0  }
   0x6   :  { %s1387_s16 = smov 0   ;;  %s1389_s17 = smov 0  }
   0x7 LB: > { %s977_s18 = sadd.s32 4294967295, %s1350_s17   ;;  %s978_s19 = sadd.s32 4294967294, %s1350_s17   ;;  %s1350_s17 = sphi %s1389_s17, %s20_s17   ;;  %s1346_s16 = sphi %s1387_s16, %s1682_s16   ;;  %s1342_s15 = sphi %s1385_s15, %s1681_s15   ;;  %s1338_s14 = sphi %s1383_s14, %s1680_s14   ;;  %s1334_s13 = sphi %s1381_s13, %s1679_s13   ;;  %s1330_s12 = sphi %s1379_s12, %s1678_s12  }
   0x8   : > { %p61_p0 = scmp.ne.s32.totalorder %s1334_s13, %s1330_s12  ;;  %p1413_p1 = scmp.eq.s32.totalorder %s977_s18, 0 }
   0x9   : > { %p1417_p2 = scmp.eq.s32.totalorder %s977_s18, 1  ;;  %p147_p3 = scmp.eq.s32.totalorder %s978_s19, 1 }
   0xa   : > { %p1423_p4 = por %p1413_p1, %p61_p0  ;;  %p979_p5 = scmp.ge.s32.totalorder %s1350_s17, 1 }
   0xb   : > { %p1428_p6 = por %p147_p3, %p61_p0  ;;  %p154_p7 = scmp.lt.s32.totalorder %s1350_s17, 3 }
   0xc   : > { %s1666_s22 = scalar_select %p1423_p4, 1, 0 }
   0xd   : > { %s1667_s23 = scalar_select %p1428_p6, 1, 0 }
   0xe   : > { %p1433_p8 = pnand %p979_p5, %p154_p7  ;;  %s1352_s25 = smov [#allocation5]  }
   0xf   : > { %s170_s26 = sshll.u32 %s1352_s25, 4  ;;  %s39_s28 = sadd.s32 1, %s1346_s16  ;;  %s171_s26 = int_to_ptr.vmem [resolvable:$true] %s170_s26 }
  0x10   : > { %p1118_p9 = pneg %p1433_p8  ;;  %s1223_s29 = scalar_lea.vmem %s171_s26, 1024 }
  0x11   : > { %p1224_p13 = scmp.ne.s32.totalorder %s171_s26, %s1223_s29  ;;  %p1231_p5 = scmp.lt.s32.totalorder %s171_s26, %s171_s26 }
  0x12   : > { %p1442_p11 = pnand %p1118_p9, %p1413_p1  ;;  %p1232_p7 = scmp.lt.s32.totalorder %s1223_s29, %s1223_s29 }
  0x14   : > { %p1214_p12 = pneg %p1442_p11  ;;  %p1233_p6 = por %p1232_p7, %p1231_p5 }
  0x16   : > { %p1226_p0 = pnand %p1224_p13, %p1214_p12 }
  0x18   : > { %p1227_p3 = pneg %p1226_p0 }
  0x1a   : > { %p1234_p4 = pnand %p1233_p6, %p1227_p3 }
  0x1c   : > { %1237 = shalt.err (!%p1234_p4)
}
  0x1d   : > { %s1662_s30 = smov 64   ;;  %s1663_s4 = smov 4  }
  0x1e   : > { %1121 = dma.hbm_to_vmem [thread:$0]  (!%p1442_p11), %s1658_s1, 1024, %s171_s26, [#allocation6], %s1662_s30, %s1662_s30, %s1663_s4  }
  0x1f   : > { %p41_p4 = scmp.ge.s32.totalorder %s39_s28, 2  ;;  %s48_s7 = sadd.s32 1, %s1338_s14 }
  0x20   : > { %p55_p6 = scmp.ne.s32.totalorder %s1338_s14, %s1334_s13  ;;  %p56_p9 = scmp.eq.s32.totalorder %s1350_s17, 0 }
  0x21   : > { %s1684_s28 = smov (%p41_p4, %s39_s28), 0  ;;  %p1131_p0 = scmp.lt.s32.totalorder %s1350_s17, 2 }
  0x22   : > { %p1463_p12 = por %p56_p9, %p55_p6  ;;  %p1469_p13 = por %p1417_p2, %p55_p6 }
  0x23   : > { %s43_s10 = ssub.s32 %s1346_s16, %s1684_s28  ;;  %s190_s11 = sand.u32 1, %s1338_s14  }
  0x24   : > { %p46_p11 = scmp.eq.s32.totalorder %s43_s10, 0  ;;  %s983_s18 = sshll.u32 %s190_s11, 7 }
  0x25   : > { %s1020_s25 = sshll.u32 %s1346_s16, 11  ;;  %s194_s5 = scalar_lea.vmem [#allocation2], %s983_s18 }
  0x26   : > { %s1478_s19 = scalar_select %p46_p11, %s1338_s14, %s48_s7  }
  0x27   : > { %s201_s29 = scalar_lea.hbm %s1657_s0, %s1020_s25  ;;  %s202_s6 = sshll.u32 %s194_s5, 4  ;;  %s203_s6 = int_to_ptr.vmem [resolvable:$true] %s202_s6 }
  0x28   : > { %p1486_p2 = pnand %p1131_p0, %p1463_p12  ;;  %s191_s30 = scalar_lea.sflag [#allocation3], %s190_s11 }
  0x29   : > { %s1251_s10 = scalar_lea.vmem %s203_s6, 2048  ;;  %s1355_s7 = smov [#allocation2]  }
  0x2a   : > { %p1240_p3 = pneg %p1486_p2  ;;  %p1252_p5 = scmp.ne.s32.totalorder %s203_s6, %s1251_s10 }
  0x2b   : > { %s1256_s4 = sshll.u32 %s1355_s7, 4  ;;  %s1257_s4 = int_to_ptr.vmem [resolvable:$false] %s1256_s4 }
  0x2c   : > { %p1254_p7 = pnand %p1252_p5, %p1240_p3  ;;  %s1258_s25 = scalar_lea.vmem %s1257_s4, 4096 }
  0x2d   : > { %p1259_p6 = scmp.lt.s32.totalorder %s203_s6, %s1257_s4  ;;  %p1260_p9 = scmp.lt.s32.totalorder %s1258_s25, %s1251_s10 }
  0x2e   : > { %p1255_p4 = pneg %p1254_p7 }
  0x2f   : > { %p1261_p11 = por %p1260_p9, %p1259_p6 }
  0x31   : > { %p1262_p10 = pnand %p1261_p11, %p1255_p4 }
  0x33   : > { %1265 = shalt.err (!%p1262_p10)
}
  0x34   : > { %s1673_s8 = smov 4   ;;  %s1674_s18 = smov 64  }
  0x35   : > { %1125 = dma.hbm_to_vmem [thread:$0]  (!%p1486_p2), %s201_s29, 2048, %s203_s6, %s191_s30, %s1674_s18, %s1674_s18, %s1673_s8  }
  0x36   : > { %214 = sbr.rel (%p1433_p8) target bundleno = 334 (0x14e), region = 32  ;;  %s1500_s11 = sand.u32 (!%p1433_p8), 1, %s1334_s13  }
  0x37   : > { %s987_s4 = sshll.u32 (!%p1433_p8), %s1500_s11, 7  ;;  %s217_s26 = scalar_lea.sflag (!%p1433_p8), [#allocation3], %s1500_s11 }
  0x38   : > { %s1504_s27 = scalar_lea.vmem (!%p1433_p8), [#allocation2], %s987_s4  ;;  %p1675_p10 = scmp.ne.s32.totalorder (!%p1433_p8), %s1666_s22, 0 }
  0x3b   : > { %1317 = dma.done.wait (%p1675_p10), %s217_s26, 2048  }
  0x3c   : > { %1319 = vsyncadd (%p1675_p10), %s217_s26, 4294965248 }
  0x3d   : > { %1321 = dma.done.wait (%p1413_p1), [#allocation6], 1024  }
  0x3e   : > { %1323 = vsyncadd (%p1413_p1), [#allocation6], 4294966272  ;;  %v1188_v0 = vld [vmem:[#allocation5 + $0x38] sm:$0xff]   ;;  %v1189_v1 = vld [vmem:[#allocation5 + $0x30] sm:$0xff]   ;;  %s989_s20 = sshll.u32 %s1500_s11, 8  ;;  %s1021_s29 = sshll.u32 %s1342_s15, 12 }
  0x3f   : > { %1046 = vmatprep.subr.bf16.mxu0 %v1188_v0  ;;  %1094 = vmatprep.subr.bf16.mxu1 %v1188_v0  ;;  %v1190_v2 = vld [vmem:[#allocation5 + $0x28] sm:$0xff]   ;;  %v1191_v3 = vld [vmem:[#allocation5 + $0x20] sm:$0xff]   ;;  %v1192_v6 = vld [vmem:[#allocation5 + $0x18] sm:$0xff]   ;;  %s1538_s30 = scalar_lea.vmem [#allocation7], %s989_s20  ;;  %s1601_s10 = scalar_lea.hbm %s1660_s3, %s1021_s29 }
  0x40   : > { %1047 = vmatpush3.bf16.msra.mxu0 %v1188_v0  ;;  %1102 = vmatpush3.bf16.msra.mxu1 %v1188_v0  ;;  %v1196_v4 = vld [vmem:[%s1504_s27] sm:$0xff]   ;;  %v1193_v7 = vld [vmem:[#allocation5 + $0x10] sm:$0xff]   ;;  %v1194_v8 = vld [vmem:[#allocation5 + $0x8] sm:$0xff]   ;;  %s863_s5 = sshll.u32 %s1538_s30, 4  ;;  %s849_s15 = scalar_lea.sflag [#allocation4], %s1500_s11  ;;  %s1603_s5 = int_to_ptr.vmem [resolvable:$true] %s863_s5 }
  0x41   : > { %1048 = vmatprep.subr.bf16.mxu0 %v1189_v1  ;;  %1095 = vmatprep.subr.bf16.mxu1 %v1189_v1  ;;  %v1197_v5 = vld [vmem:[%s1504_s27 + $0x40] sm:$0xff]   ;;  %v1198_v10 = vld [vmem:[%s1504_s27 + $0x8] sm:$0xff]   ;;  %v1200_v12 = vld [vmem:[%s1504_s27 + $0x10] sm:$0xff]   ;;  %s1266_s7 = scalar_lea.vmem %s1603_s5, 4096  ;;  %s1356_s25 = smov [#allocation7]  }
  0x42   : > { %1062 = vmatprep.mubr.bf16.mxu0 %v1196_v4  ;;  %1078 = vmatprep.mubr.bf16.mxu1 %v1197_v5  ;;  %v1195_v9 = vld [vmem:[#allocation5] sm:$0xff]   ;;  %v1199_v11 = vld [vmem:[%s1504_s27 + $0x48] sm:$0xff]   ;;  %v1201_v13 = vld [vmem:[%s1504_s27 + $0x50] sm:$0xff]   ;;  %p1267_p1 = scmp.ne.s32.totalorder %s1603_s5, %s1266_s7  ;;  %s1270_s8 = sshll.u32 %s1356_s25, 4  ;;  %s1271_s8 = int_to_ptr.vmem [resolvable:$false] %s1270_s8 }
  0x43   : > { %v1202_v14 = vld [vmem:[%s1504_s27 + $0x18] sm:$0xff]   ;;  %v1204_v16 = vld [vmem:[%s1504_s27 + $0x20] sm:$0xff]   ;;  %v1206_v18 = vld [vmem:[%s1504_s27 + $0x28] sm:$0xff]   ;;  %s1272_s18 = scalar_lea.vmem %s1271_s8, 8192  ;;  %p1273_p0 = scmp.lt.s32.totalorder %s1603_s5, %s1271_s8 }
  0x44   : > { %1049 = vmatpush3.bf16.msra.mxu0 %v1189_v1  ;;  %1103 = vmatpush3.bf16.msra.mxu1 %v1189_v1  ;;  %v1203_v15 = vld [vmem:[%s1504_s27 + $0x58] sm:$0xff]   ;;  %v1205_v17 = vld [vmem:[%s1504_s27 + $0x60] sm:$0xff]   ;;  %v1207_v19 = vld [vmem:[%s1504_s27 + $0x68] sm:$0xff]   ;;  %p1268_p8 = pnand %p1267_p1, %p1469_p13  ;;  %p1274_p2 = scmp.lt.s32.totalorder %s1272_s18, %s1266_s7 }
  0x45   : > { %1050 = vmatprep.subr.bf16.mxu0 %v1190_v2  ;;  %1096 = vmatprep.subr.bf16.mxu1 %v1190_v2  ;;  %v1208_v20 = vld [vmem:[%s1504_s27 + $0x30] sm:$0xff]   ;;  %v1210_v22 = vld [vmem:[%s1504_s27 + $0x38] sm:$0xff]   ;;  %v1534_v25 = vld [vmem:[%s1659_s2] ss:$0 sm:$0xff] }
  0x46   : > { %v1209_v21 = vld [vmem:[%s1504_s27 + $0x70] sm:$0xff]   ;;  %v1211_v23 = vld [vmem:[%s1504_s27 + $0x78] sm:$0xff]   ;;  %p1269_p12 = pneg %p1268_p8  ;;  %p1275_p3 = por %p1274_p2, %p1273_p0 }
  0x48   : > { %1051 = vmatpush3.bf16.msra.mxu0 %v1190_v2  ;;  %1104 = vmatpush3.bf16.msra.mxu1 %v1190_v2  ;;  %p1276_p5 = pnand %p1275_p3, %p1269_p12 }
  0x49   : > { %1052 = vmatprep.subr.bf16.mxu0 %v1191_v3  ;;  %1097 = vmatprep.subr.bf16.mxu1 %v1191_v3 }
  0x4c   : > { %1053 = vmatpush3.bf16.msra.mxu0 %v1191_v3  ;;  %1105 = vmatpush3.bf16.msra.mxu1 %v1191_v3 }
  0x4d   : > { %1054 = vmatprep.subr.bf16.mxu0 %v1192_v6  ;;  %1098 = vmatprep.subr.bf16.mxu1 %v1192_v6 }
  0x50   : > { %1055 = vmatpush3.bf16.msra.mxu0 %v1192_v6  ;;  %1106 = vmatpush3.bf16.msra.mxu1 %v1192_v6 }
  0x51   : > { %1056 = vmatprep.subr.bf16.mxu0 %v1193_v7  ;;  %1099 = vmatprep.subr.bf16.mxu1 %v1193_v7 }
  0x54   : > { %1057 = vmatpush3.bf16.msra.mxu0 %v1193_v7  ;;  %1107 = vmatpush3.bf16.msra.mxu1 %v1193_v7 }
  0x55   : > { %1058 = vmatprep.subr.bf16.mxu0 %v1194_v8  ;;  %1100 = vmatprep.subr.bf16.mxu1 %v1194_v8 }
  0x58   : > { %1059 = vmatpush3.bf16.msra.mxu0 %v1194_v8  ;;  %1108 = vmatpush3.bf16.msra.mxu1 %v1194_v8 }
  0x59   : > { %1060 = vmatprep.subr.bf16.mxu0 %v1195_v9  ;;  %1101 = vmatprep.subr.bf16.mxu1 %v1195_v9 }
  0x5c   : > { %1061 = vmatpush3.bf16.msra.mxu0 %v1195_v9  ;;  %1109 = vmatpush3.bf16.msra.mxu1 %v1195_v9 }
  0x5f   : > { %1063 = vmatmul.mubr.bf16.vlgmr.msra.gmra.mxu0 %v1198_v10  ;;  %1079 = vmatmul.mubr.bf16.vlgmr.msra.gmra.mxu1 %v1199_v11 }
  0x60   : > { %1066 = vmatprep.mubr.bf16.mxu0 %v1200_v12  ;;  %1082 = vmatprep.mubr.bf16.mxu1 %v1201_v13 }
  0x67   : > { %1067 = vmatmul.mubr.bf16.gmra.mxu0 %v1202_v14  ;;  %1083 = vmatmul.mubr.bf16.gmra.mxu1 %v1203_v15 }
  0x68   : > { %1070 = vmatprep.mubr.bf16.mxu0 %v1204_v16  ;;  %1086 = vmatprep.mubr.bf16.mxu1 %v1205_v17 }
  0x6f   : > { %1071 = vmatmul.mubr.bf16.gmra.mxu0 %v1206_v18  ;;  %1087 = vmatmul.mubr.bf16.gmra.mxu1 %v1207_v19 }
  0x70   : > { %1074 = vmatprep.mubr.bf16.mxu0 %v1208_v20  ;;  %1090 = vmatprep.mubr.bf16.mxu1 %v1209_v21 }
  0x77   : > { %1075 = vmatmul.mubr.bf16.gmra.mxu0 %v1210_v22  ;;  %1091 = vmatmul.mubr.bf16.gmra.mxu1 %v1211_v23 }
 0x11f   : > { %v1064_v24 = vpop.f32.mrf.mxu0  ;;  %v1080_v26 = vpop.f32.mrf.mxu1 }
 0x120   : > { %v786_v29 = vadd.f32 %v1064_v24, %v1534_v25  ;;  %v802_v30 = vadd.f32 %v1080_v26, %v1534_v25 }
 0x121   : > { %v551_v27 = vpop.f32.mrf.mxu0  ;;  %v615_v28 = vpop.f32.mrf.mxu1 }
 0x122   : > { %818 = vst [vmem:[%s1538_s30 + $0x10] sm:$0xff] %v786_v29  ;;  %834 = vst [vmem:[%s1538_s30 + $0x90] sm:$0xff] %v802_v30  ;;  %v784_v33 = vadd.f32 %v1534_v25, %v551_v27  ;;  %v800_v34 = vadd.f32 %v1534_v25, %v615_v28 }
 0x123   : > { %v1065_v31 = vpop.f32.mrf.mxu0  ;;  %v1081_v32 = vpop.f32.mrf.mxu1 }
 0x124   : > { %816 = vst [vmem:[%s1538_s30] sm:$0xff] %v784_v33  ;;  %832 = vst [vmem:[%s1538_s30 + $0x80] sm:$0xff] %v800_v34  ;;  %v787_v37 = vadd.f32 %v1065_v31, %v1534_v25  ;;  %v803_v38 = vadd.f32 %v1081_v32, %v1534_v25 }
 0x125   : > { %v554_v35 = vpop.f32.mrf.mxu0  ;;  %v618_v36 = vpop.f32.mrf.mxu1 }
 0x126   : > { %819 = vst [vmem:[%s1538_s30 + $0x18] sm:$0xff] %v787_v37  ;;  %835 = vst [vmem:[%s1538_s30 + $0x98] sm:$0xff] %v803_v38  ;;  %v785_v41 = vadd.f32 %v1534_v25, %v554_v35  ;;  %v801_v42 = vadd.f32 %v1534_v25, %v618_v36 }
 0x127   : > { %v1068_v39 = vpop.f32.mrf.mxu0  ;;  %v1084_v40 = vpop.f32.mrf.mxu1 }
 0x128   : > { %817 = vst [vmem:[%s1538_s30 + $0x8] sm:$0xff] %v785_v41  ;;  %833 = vst [vmem:[%s1538_s30 + $0x88] sm:$0xff] %v801_v42  ;;  %v790_v45 = vadd.f32 %v1068_v39, %v1534_v25  ;;  %v806_v46 = vadd.f32 %v1084_v40, %v1534_v25 }
 0x129   : > { %v567_v43 = vpop.f32.mrf.mxu0  ;;  %v631_v44 = vpop.f32.mrf.mxu1 }
 0x12a   : > { %822 = vst [vmem:[%s1538_s30 + $0x30] sm:$0xff] %v790_v45  ;;  %838 = vst [vmem:[%s1538_s30 + $0xb0] sm:$0xff] %v806_v46  ;;  %v788_v49 = vadd.f32 %v1534_v25, %v567_v43  ;;  %v804_v50 = vadd.f32 %v1534_v25, %v631_v44 }
 0x12b   : > { %v1069_v47 = vpop.f32.mrf.mxu0  ;;  %v1085_v48 = vpop.f32.mrf.mxu1 }
 0x12c   : > { %820 = vst [vmem:[%s1538_s30 + $0x20] sm:$0xff] %v788_v49  ;;  %836 = vst [vmem:[%s1538_s30 + $0xa0] sm:$0xff] %v804_v50  ;;  %v791_v53 = vadd.f32 %v1069_v47, %v1534_v25  ;;  %v807_v54 = vadd.f32 %v1085_v48, %v1534_v25 }
 0x12d   : > { %v570_v51 = vpop.f32.mrf.mxu0  ;;  %v634_v52 = vpop.f32.mrf.mxu1 }
 0x12e   : > { %823 = vst [vmem:[%s1538_s30 + $0x38] sm:$0xff] %v791_v53  ;;  %839 = vst [vmem:[%s1538_s30 + $0xb8] sm:$0xff] %v807_v54  ;;  %v789_v57 = vadd.f32 %v1534_v25, %v570_v51  ;;  %v805_v58 = vadd.f32 %v1534_v25, %v634_v52 }
 0x12f   : > { %v1072_v55 = vpop.f32.mrf.mxu0  ;;  %v1088_v56 = vpop.f32.mrf.mxu1 }
 0x130   : > { %821 = vst [vmem:[%s1538_s30 + $0x28] sm:$0xff] %v789_v57  ;;  %837 = vst [vmem:[%s1538_s30 + $0xa8] sm:$0xff] %v805_v58  ;;  %v794_v61 = vadd.f32 %v1072_v55, %v1534_v25  ;;  %v810_v62 = vadd.f32 %v1088_v56, %v1534_v25 }
 0x131   : > { %v583_v59 = vpop.f32.mrf.mxu0  ;;  %v647_v60 = vpop.f32.mrf.mxu1 }
 0x132   : > { %826 = vst [vmem:[%s1538_s30 + $0x50] sm:$0xff] %v794_v61  ;;  %842 = vst [vmem:[%s1538_s30 + $0xd0] sm:$0xff] %v810_v62  ;;  %v792_v1 = vadd.f32 %v1534_v25, %v583_v59  ;;  %v808_v2 = vadd.f32 %v1534_v25, %v647_v60 }
 0x133   : > { %v1073_v63 = vpop.f32.mrf.mxu0  ;;  %v1089_v0 = vpop.f32.mrf.mxu1 }
 0x134   : > { %824 = vst [vmem:[%s1538_s30 + $0x40] sm:$0xff] %v792_v1  ;;  %840 = vst [vmem:[%s1538_s30 + $0xc0] sm:$0xff] %v808_v2  ;;  %v795_v5 = vadd.f32 %v1073_v63, %v1534_v25  ;;  %v811_v6 = vadd.f32 %v1089_v0, %v1534_v25 }
 0x135   : > { %v586_v3 = vpop.f32.mrf.mxu0  ;;  %v650_v4 = vpop.f32.mrf.mxu1 }
 0x136   : > { %827 = vst [vmem:[%s1538_s30 + $0x58] sm:$0xff] %v795_v5  ;;  %843 = vst [vmem:[%s1538_s30 + $0xd8] sm:$0xff] %v811_v6  ;;  %v793_v9 = vadd.f32 %v1534_v25, %v586_v3  ;;  %v809_v10 = vadd.f32 %v1534_v25, %v650_v4 }
 0x137   : > { %v1076_v7 = vpop.f32.mrf.mxu0  ;;  %v1092_v8 = vpop.f32.mrf.mxu1 }
 0x138   : > { %825 = vst [vmem:[%s1538_s30 + $0x48] sm:$0xff] %v793_v9  ;;  %841 = vst [vmem:[%s1538_s30 + $0xc8] sm:$0xff] %v809_v10  ;;  %v798_v13 = vadd.f32 %v1076_v7, %v1534_v25  ;;  %v814_v14 = vadd.f32 %v1092_v8, %v1534_v25 }
 0x139   : > { %v599_v11 = vpop.f32.mrf.mxu0  ;;  %v663_v12 = vpop.f32.mrf.mxu1 }
 0x13a   : > { %830 = vst [vmem:[%s1538_s30 + $0x70] sm:$0xff] %v798_v13  ;;  %846 = vst [vmem:[%s1538_s30 + $0xf0] sm:$0xff] %v814_v14  ;;  %v796_v17 = vadd.f32 %v1534_v25, %v599_v11  ;;  %v812_v18 = vadd.f32 %v1534_v25, %v663_v12 }
 0x13b   : > { %v1077_v15 = vpop.f32.mrf.mxu0  ;;  %v1093_v16 = vpop.f32.mrf.mxu1 }
 0x13c   : > { %828 = vst [vmem:[%s1538_s30 + $0x60] sm:$0xff] %v796_v17  ;;  %844 = vst [vmem:[%s1538_s30 + $0xe0] sm:$0xff] %v812_v18  ;;  %v799_v21 = vadd.f32 %v1077_v15, %v1534_v25  ;;  %v815_v22 = vadd.f32 %v1093_v16, %v1534_v25 }
 0x13d   : > { %v602_v19 = vpop.f32.mrf.mxu0  ;;  %v666_v20 = vpop.f32.mrf.mxu1 }
 0x13e   : > { %831 = vst [vmem:[%s1538_s30 + $0x78] sm:$0xff] %v799_v21  ;;  %847 = vst [vmem:[%s1538_s30 + $0xf8] sm:$0xff] %v815_v22  ;;  %v797_v23 = vadd.f32 %v1534_v25, %v602_v19  ;;  %v813_v24 = vadd.f32 %v1534_v25, %v666_v20 }
 0x140   : > { %829 = vst [vmem:[%s1538_s30 + $0x68] sm:$0xff] %v797_v23  ;;  %845 = vst [vmem:[%s1538_s30 + $0xe8] sm:$0xff] %v813_v24 }
 0x141   : > { %1279 = shalt.err (!%p1276_p5)
}
 0x142   : > { %s1280_s4 = scalar_lea.hbm %s1601_s10, 4096  ;;  %s1284_s20 = scalar_lea.hbm %s1660_s3, 8192 }
 0x143   : > { %p1281_p7 = scmp.ne.s32.totalorder %s1601_s10, %s1280_s4  ;;  %p1285_p9 = scmp.lt.s32.totalorder %s1601_s10, %s1660_s3 }
 0x144   : > { %p1286_p11 = scmp.lt.s32.totalorder %s1284_s20, %s1280_s4 }
 0x145   : > { %p1282_p4 = pnand %p1281_p7, %p1469_p13 }
 0x146   : > { %p1287_p10 = por %p1286_p11, %p1285_p9 }
 0x147   : > { %p1283_p6 = pneg %p1282_p4 }
 0x149   : > { %p1288_p1 = pnand %p1287_p10, %p1283_p6 }
 0x14b   : > { %1291 = shalt.err (!%p1288_p1)
}
 0x14c   : > { %s1357_s30 = smov 128   ;;  %s1358_s29 = smov 8  }
 0x14d   : > { %1116 = dma.vmem_to_hbm [thread:$0]  (%p1469_p13), %s1603_s5, 4096, %s1601_s10, %s849_s15, %s1357_s30, %s1357_s30, %s1358_s29  }
 0x14e PF: > { %s878_s6 = sand.u32 1, %s1330_s12   ;;  %p1676_p8 = scmp.ne.s32.totalorder %s1667_s23, 0 }
 0x14f   : > { %p1677_p12 = scmp.ge.s32.totalorder %s1350_s17, 2  ;;  %s879_s21 = scalar_lea.sflag [#allocation4], %s878_s6 }
 0x151   : > { %p1127_p0 = pnand %p1677_p12, %p1676_p8 }
 0x153   : > { %p1128_p2 = pneg %p1127_p0 }
 0x155   : > { %1325 = dma.done.wait (%p1128_p2), %s879_s21, 4096  }
 0x156   : > { %1327 = vsyncadd (%p1128_p2), %s879_s21, 4294963200  ;;  %s20_s17 = sadd.s32 1, %s1350_s17   ;;  %s1678_s12 = smov %s1334_s13 }
 0x157   : > { %p17_p3 = scmp.ge.s32.totalorder %s20_s17, 4   ;;  %s1679_s13 = smov %s1338_s14 }
 0x158   : > { %s1680_s14 = smov %s1478_s19  ;;  %s1681_s15 = smov %s1346_s16 }
 0x159   : > { %s1682_s16 = smov %s1684_s28  ;;  %19 = sbr.rel (!%p17_p3) target bundleno = 7 (0x7), region = 93 }
 0x15e   :  { %884 = vsyncpa [#allocation3], 1 }
 0x15f   :  { %886 = vsyncpa [#allocation3 + $0x1], 1 }
 0x160   :  { %887 = vsyncpa [#allocation6], 1 }
 0x161   :  { %888 = vsyncpa [#allocation4], 1 }
 0x162   :  { %890 = vsyncpa [#allocation4 + $0x1], 1 }

</bundles_post_ra>
